<compile_context>
chip_gen: v7x
topology: tpu7x:2x2x1
jax: 0.10.0
libtpu: 0.0.40
codegen_flags: <defaults>
</compile_context>

<pallas_src>
import functools

import jax
import jax.numpy as jnp
from jax import lax
from jax.experimental import pallas as pl
from jax.experimental.pallas import tpu as pltpu


def _ntxent_kernel(anchor_ref, pos_ref, c0_ref, c1_ref, o_ref, m_s, l_s, *,
                   inv_temp):
    # anchor_ref: [tm, dim]  anchor rows (view 0), resident across the j axis
    # pos_ref:    [tm, dim]  matching view-1 rows (positive pairs), resident
    # c0_ref:     [tn, dim]  contrast column tile from view 0
    # c1_ref:     [tn, dim]  contrast column tile from view 1
    # o_ref:      [tm, 1]    per-sample loss for this row tile
    # m_s, l_s:   [tm, 1]    running row-max / running sum-exp (f32 scratch)
    i = pl.program_id(0)           # anchor row tile
    j = pl.program_id(1)           # contrast column tile (covers both views)
    nj = pl.num_programs(1)
    tm = anchor_ref.shape[0]
    tn = c0_ref.shape[0]

    @pl.when(j == 0)
    def _init():
        m_s[...] = jnp.full_like(m_s, -jnp.inf)
        l_s[...] = jnp.zeros_like(l_s)

    # Native-dtype operands into the MXU (bf16-in / f32-acc is the fast path);
    # 1/temperature is folded into the small [tm, dim] anchor tile.
    a = anchor_ref[...]
    a_scaled = a * inv_temp

    dims = (((1,), (1,)), ((), ()))            # contract the feature dim
    s0 = lax.dot_general(a_scaled, c0_ref[...], dims,
                         preferred_element_type=jnp.float32)   # [tm, tn]
    s1 = lax.dot_general(a_scaled, c1_ref[...], dims,
                         preferred_element_type=jnp.float32)   # [tm, tn]

    # Row max matches the reference: taken over the *unmasked* logits.
    m_tile = jnp.maximum(jnp.max(s0, axis=1, keepdims=True),
                         jnp.max(s1, axis=1, keepdims=True))
    m_prev = m_s[...]
    m_new = jnp.maximum(m_prev, m_tile)

    # Mask the self-similarity column (view-0 diagonal) *before* the exp:
    # one select, no float mask buffer.
    row_g = i * tm + lax.broadcasted_iota(jnp.int32, (tm, tn), 0)
    col_g = j * tn + lax.broadcasted_iota(jnp.int32, (tm, tn), 1)
    s0 = jnp.where(col_g == row_g, -1e30, s0)

    # Online (flash-style) log-sum-exp update.
    alpha = jnp.exp(m_prev - m_new)            # exp(-inf)=0 handles j==0
    tile_sum = (jnp.sum(jnp.exp(s0 - m_new), axis=1, keepdims=True) +
                jnp.sum(jnp.exp(s1 - m_new), axis=1, keepdims=True))
    l_s[...] = alpha * l_s[...] + tile_sum
    m_s[...] = m_new

    @pl.when(j == nj - 1)
    def _finalize():
        # Positive logit computed directly: <anchor_i, view1_i> / T  (f32).
        pos = jnp.sum(a.astype(jnp.float32) * pos_ref[...].astype(jnp.float32),
                      axis=1, keepdims=True) * inv_temp
        # per-sample loss = log-sum-exp(denominator) - positive logit
        o_ref[...] = (m_s[...] + jnp.log(l_s[...]) - pos).astype(o_ref.dtype)


def _pick_tile(n, target):
    """Largest tile <= target that divides n (8-aligned when actually tiling)."""
    if n <= target:
        return n
    for t in range(target, 7, -1):
        if t % 8 == 0 and n % t == 0:
            return t
    return n  # no aligned divisor: fall back to a single tile on this axis


def ntxent_loss(features, temperature, *, row_tile=128, col_tile=256):
    """features: [b, 2, dim]. Returns the scalar SimCLR NT-Xent loss (f32)."""
    b, n, dim = features.shape
    assert n == 2
    view0 = features[:, 0]     # anchors / first contrast half   [b, dim]
    view1 = features[:, 1]     # positives / second contrast half [b, dim]

    tm = _pick_tile(b, row_tile)
    tn = _pick_tile(b, col_tile)
    grid = (b // tm, b // tn)
    inv_temp = 1.0 / float(temperature)

    per_sample = pl.pallas_call(
        functools.partial(_ntxent_kernel, inv_temp=inv_temp),
        out_shape=jax.ShapeDtypeStruct((b, 1), jnp.float32),
        grid_spec=pltpu.PrefetchScalarGridSpec(
            num_scalar_prefetch=0,
            grid=grid,
            in_specs=[
                pl.BlockSpec((tm, dim), lambda i, j: (i, 0)),  # anchor rows
                pl.BlockSpec((tm, dim), lambda i, j: (i, 0)),  # positive rows
                pl.BlockSpec((tn, dim), lambda i, j: (j, 0)),  # contrast: view 0
                pl.BlockSpec((tn, dim), lambda i, j: (j, 0)),  # contrast: view 1
            ],
            out_specs=pl.BlockSpec((tm, 1), lambda i, j: (i, 0)),
            scratch_shapes=[
                pltpu.VMEM((tm, 1), jnp.float32),   # running row max
                pltpu.VMEM((tm, 1), jnp.float32),   # running sum-exp
            ],
        ),
        compiler_params=pltpu.CompilerParams(
            dimension_semantics=("parallel", "arbitrary")),
    )(view0, view1, view0, view1)

    return jnp.mean(per_sample)


def _ntxent_loss_ref(features, temperature):
    """Pure-JAX reference, mathematically identical to the PyTorch module.

    The positive logit dot[i, i+b] is written directly as <anchor_i, view1_i>/T
    (it is exactly that entry of the matmul), which keeps the comparison robust
    to the backend's default f32-matmul precision mode. Everything else mirrors
    the module: row max over the unmasked logits, self column excluded from the
    exp-sum, mean over the batch.
    """
    b, n, dim = features.shape
    anchor = features[:, 0]
    view1 = features[:, 1]
    contrast = jnp.concatenate([anchor, view1], axis=0)          # [2b, dim]
    dot = (anchor @ contrast.T) / temperature                    # [b, 2b]
    logits_max = jnp.max(dot, axis=1, keepdims=True)
    logits = dot - logits_max
    idx = jnp.arange(b)
    logits_mask = jnp.ones((b, 2 * b), jnp.float32).at[idx, idx].set(0.0)
    exp_logits = jnp.exp(logits) * logits_mask
    log_denom = logits_max[:, 0] + jnp.log(exp_logits.sum(axis=1))
    pos = jnp.sum(anchor * view1, axis=1) / temperature          # == dot[i, i+b]
    return jnp.mean(log_denom - pos)


if __name__ == "__main__":
    temperature = 0.5

    # Small shape consistent with the module's [b, 2, dim] input.
    b, dim = 8, 32
    features = jax.random.normal(jax.random.PRNGKey(0), (b, 2, dim),
                                 dtype=jnp.float32)
    loss = jax.block_until_ready(ntxent_loss(features, temperature))
    ref = jax.block_until_ready(_ntxent_loss_ref(features, temperature))
    assert jnp.allclose(loss, ref, rtol=1e-4, atol=1e-4), (loss, ref)

    # A shape that exercises the real (row, col) grid and the online LSE.
    b2, dim2 = 512, 128
    features2 = jax.random.normal(jax.random.PRNGKey(1), (b2, 2, dim2),
                                  dtype=jnp.float32)
    loss2 = jax.block_until_ready(ntxent_loss(features2, temperature))
    ref2 = jax.block_until_ready(_ntxent_loss_ref(features2, temperature))
    assert jnp.allclose(loss2, ref2, rtol=1e-4, atol=1e-4), (loss2, ref2)

    print("KERNEL_OK")
</pallas_src>

<mosaic_0001>
module attributes {stable_mosaic.version = 11 : i64} {
  func.func @_ntxent_kernel(%arg0: i32, %arg1: i32, %arg2: memref<8x32xf32, #tpu.memory_space<vmem>>, %arg3: memref<8x32xf32, #tpu.memory_space<vmem>>, %arg4: memref<8x32xf32, #tpu.memory_space<vmem>>, %arg5: memref<8x32xf32, #tpu.memory_space<vmem>>, %arg6: memref<8x1xf32, #tpu.memory_space<vmem>>, %arg7: memref<8x1xf32, #tpu.memory_space<vmem>>, %arg8: memref<8x1xf32, #tpu.memory_space<vmem>>) attributes {dimension_semantics = [#tpu.dimension_semantics<parallel>, #tpu.dimension_semantics<arbitrary>], iteration_bounds = array<i64: 1, 1>, scalar_prefetch = 0 : i64, scratch_operands = 2 : i64, tpu.core_type = #tpu.core_type<tc>, window_params = [{transform_indices = @transform_0, window_bounds = array<i64: 8, 32>}, {transform_indices = @transform_1, window_bounds = array<i64: 8, 32>}, {transform_indices = @transform_2, window_bounds = array<i64: 8, 32>}, {transform_indices = @transform_3, window_bounds = array<i64: 8, 32>}, {transform_indices = @transform_4, window_bounds = array<i64: 8, 1>}]} {
    %c0_i32 = arith.constant 0 : i32
    %0 = arith.cmpi eq, %arg1, %c0_i32 : i32
    %1 = arith.extui %0 : i1 to i32
    %c0_i32_0 = arith.constant 0 : i32
    %2 = arith.cmpi ne, %1, %c0_i32_0 : i32
    scf.if %2 {
      %cst_24 = arith.constant 0xFF800000 : f32
      %49 = vector.broadcast %cst_24 : f32 to vector<8x1xf32>
      %c0_25 = arith.constant 0 : index
      %c0_26 = arith.constant 0 : index
      %50 = vector.load %arg7[%c0_25, %c0_26] : memref<8x1xf32, #tpu.memory_space<vmem>>, vector<8x1xf32>
      tpu.vector_store %arg7[%c0_25, %c0_26], %49 {strides = array<i32>} : memref<8x1xf32, #tpu.memory_space<vmem>>, vector<8x1xf32>,
      %cst_27 = arith.constant 0.000000e+00 : f32
      %51 = vector.broadcast %cst_27 : f32 to vector<8x1xf32>
      %c0_28 = arith.constant 0 : index
      %c0_29 = arith.constant 0 : index
      %52 = vector.load %arg8[%c0_28, %c0_29] : memref<8x1xf32, #tpu.memory_space<vmem>>, vector<8x1xf32>
      tpu.vector_store %arg8[%c0_28, %c0_29], %51 {strides = array<i32>} : memref<8x1xf32, #tpu.memory_space<vmem>>, vector<8x1xf32>,
    } else {
    }
    %c0 = arith.constant 0 : index
    %c0_1 = arith.constant 0 : index
    %3 = vector.load %arg2[%c0, %c0_1] : memref<8x32xf32, #tpu.memory_space<vmem>>, vector<8x32xf32>
    %cst = arith.constant 2.000000e+00 : f32
    %4 = vector.broadcast %cst : f32 to vector<8x32xf32>
    %5 = arith.mulf %3, %4 : vector<8x32xf32>
    %c0_2 = arith.constant 0 : index
    %c0_3 = arith.constant 0 : index
    %6 = vector.load %arg4[%c0_2, %c0_3] : memref<8x32xf32, #tpu.memory_space<vmem>>, vector<8x32xf32>
    %cst_4 = arith.constant dense<0.000000e+00> : vector<8x8xf32>
    %7 = tpu.matmul %5, %6, %cst_4 {dimension_numbers = #tpu.dot_dimension_numbers<[1], [1], [0], [0], [0, 0, 1, 0], [], []>} : vector<8x32xf32>, vector<8x32xf32>, vector<8x8xf32> -> vector<8x8xf32>
    %c0_5 = arith.constant 0 : index
    %c0_6 = arith.constant 0 : index
    %8 = vector.load %arg5[%c0_5, %c0_6] : memref<8x32xf32, #tpu.memory_space<vmem>>, vector<8x32xf32>
    %cst_7 = arith.constant dense<0.000000e+00> : vector<8x8xf32>
    %9 = tpu.matmul %5, %8, %cst_7 {dimension_numbers = #tpu.dot_dimension_numbers<[1], [1], [0], [0], [0, 0, 1, 0], [], []>} : vector<8x32xf32>, vector<8x32xf32>, vector<8x8xf32> -> vector<8x8xf32>
    %cst_8 = arith.constant dense<0xFF800000> : vector<8xf32>
    %10 = vector.multi_reduction <maximumf>, %7, %cst_8 [1] : vector<8x8xf32> to vector<8xf32>
    %11 = vector.shape_cast %10 : vector<8xf32> to vector<8x1xf32>
    %cst_9 = arith.constant dense<0xFF800000> : vector<8xf32>
    %12 = vector.multi_reduction <maximumf>, %9, %cst_9 [1] : vector<8x8xf32> to vector<8xf32>
    %13 = vector.shape_cast %12 : vector<8xf32> to vector<8x1xf32>
    %14 = arith.maximumf %11, %13 : vector<8x1xf32>
    %c0_10 = arith.constant 0 : index
    %c0_11 = arith.constant 0 : index
    %15 = vector.load %arg7[%c0_10, %c0_11] : memref<8x1xf32, #tpu.memory_space<vmem>>, vector<8x1xf32>
    %16 = arith.maximumf %15, %14 : vector<8x1xf32>
    %c8_i32 = arith.constant 8 : i32
    %17 = arith.muli %arg0, %c8_i32 : i32
    %18 = tpu.iota {dimensions = array<i32: 0>} : vector<8x8xi32>
    %19 = vector.broadcast %17 : i32 to vector<8x8xi32>
    %20 = arith.addi %19, %18 : vector<8x8xi32>
    %c8_i32_12 = arith.constant 8 : i32
    %21 = arith.muli %arg1, %c8_i32_12 : i32
    %22 = tpu.iota {dimensions = array<i32: 1>} : vector<8x8xi32>
    %23 = vector.broadcast %21 : i32 to vector<8x8xi32>
    %24 = arith.addi %23, %22 : vector<8x8xi32>
    %25 = arith.cmpi eq, %24, %20 : vector<8x8xi32>
    %cst_13 = arith.constant -1.000000e+30 : f32
    %26 = vector.broadcast %cst_13 : f32 to vector<8x8xf32>
    %27 = arith.select %25, %26, %7 : vector<8x8xi1>, vector<8x8xf32>
    %28 = arith.subf %15, %16 : vector<8x1xf32>
    %29 = math.exp %28 : vector<8x1xf32>
    %30 = vector.broadcast %16 : vector<8x1xf32> to vector<8x8xf32>
    %31 = arith.subf %27, %30 : vector<8x8xf32>
    %32 = math.exp %31 : vector<8x8xf32>
    %cst_14 = arith.constant dense<0.000000e+00> : vector<8xf32>
    %33 = vector.multi_reduction <add>, %32, %cst_14 [1] : vector<8x8xf32> to vector<8xf32>
    %34 = vector.shape_cast %33 : vector<8xf32> to vector<8x1xf32>
    %35 = vector.broadcast %16 : vector<8x1xf32> to vector<8x8xf32>
    %36 = arith.subf %9, %35 : vector<8x8xf32>
    %37 = math.exp %36 : vector<8x8xf32>
    %cst_15 = arith.constant dense<0.000000e+00> : vector<8xf32>
    %38 = vector.multi_reduction <add>, %37, %cst_15 [1] : vector<8x8xf32> to vector<8xf32>
    %39 = vector.shape_cast %38 : vector<8xf32> to vector<8x1xf32>
    %40 = arith.addf %34, %39 : vector<8x1xf32>
    %c0_16 = arith.constant 0 : index
    %c0_17 = arith.constant 0 : index
    %41 = vector.load %arg8[%c0_16, %c0_17] : memref<8x1xf32, #tpu.memory_space<vmem>>, vector<8x1xf32>
    %42 = arith.mulf %29, %41 : vector<8x1xf32>
    %43 = arith.addf %42, %40 : vector<8x1xf32>
    %c0_18 = arith.constant 0 : index
    %c0_19 = arith.constant 0 : index
    %44 = vector.load %arg8[%c0_18, %c0_19] : memref<8x1xf32, #tpu.memory_space<vmem>>, vector<8x1xf32>
    tpu.vector_store %arg8[%c0_18, %c0_19], %43 {strides = array<i32>} : memref<8x1xf32, #tpu.memory_space<vmem>>, vector<8x1xf32>,
    %c0_20 = arith.constant 0 : index
    %c0_21 = arith.constant 0 : index
    %45 = vector.load %arg7[%c0_20, %c0_21] : memref<8x1xf32, #tpu.memory_space<vmem>>, vector<8x1xf32>
    tpu.vector_store %arg7[%c0_20, %c0_21], %16 {strides = array<i32>} : memref<8x1xf32, #tpu.memory_space<vmem>>, vector<8x1xf32>,
    %c0_i32_22 = arith.constant 0 : i32
    %46 = arith.cmpi eq, %arg1, %c0_i32_22 : i32
    %47 = arith.extui %46 : i1 to i32
    %c0_i32_23 = arith.constant 0 : i32
    %48 = arith.cmpi ne, %47, %c0_i32_23 : i32
    scf.if %48 {
      %c0_24 = arith.constant 0 : index
      %c0_25 = arith.constant 0 : index
      %49 = vector.load %arg3[%c0_24, %c0_25] : memref<8x32xf32, #tpu.memory_space<vmem>>, vector<8x32xf32>
      %50 = arith.mulf %3, %49 : vector<8x32xf32>
      %cst_26 = arith.constant dense<0.000000e+00> : vector<8xf32>
      %51 = vector.multi_reduction <add>, %50, %cst_26 [1] : vector<8x32xf32> to vector<8xf32>
      %52 = vector.shape_cast %51 : vector<8xf32> to vector<8x1xf32>
      %cst_27 = arith.constant 2.000000e+00 : f32
      %53 = vector.broadcast %cst_27 : f32 to vector<8x1xf32>
      %54 = arith.mulf %52, %53 : vector<8x1xf32>
      %c0_28 = arith.constant 0 : index
      %c0_29 = arith.constant 0 : index
      %55 = vector.load %arg7[%c0_28, %c0_29] : memref<8x1xf32, #tpu.memory_space<vmem>>, vector<8x1xf32>
      %c0_30 = arith.constant 0 : index
      %c0_31 = arith.constant 0 : index
      %56 = vector.load %arg8[%c0_30, %c0_31] : memref<8x1xf32, #tpu.memory_space<vmem>>, vector<8x1xf32>
      %57 = math.log %56 : vector<8x1xf32>
      %58 = arith.addf %55, %57 : vector<8x1xf32>
      %59 = arith.subf %58, %54 : vector<8x1xf32>
      %c0_32 = arith.constant 0 : index
      %c0_33 = arith.constant 0 : index
      %60 = vector.load %arg6[%c0_32, %c0_33] : memref<8x1xf32, #tpu.memory_space<vmem>>, vector<8x1xf32>
      tpu.vector_store %arg6[%c0_32, %c0_33], %59 {strides = array<i32>} : memref<8x1xf32, #tpu.memory_space<vmem>>, vector<8x1xf32>,
    } else {
    }
    return
  }
  func.func @transform_0(%arg0: i32, %arg1: i32) -> (i32, i32) {
    %c0_i32 = arith.constant 0 : i32
    %c0_i32_0 = arith.constant 0 : i32
    return %arg0, %c0_i32 : i32, i32
  }
  func.func @transform_1(%arg0: i32, %arg1: i32) -> (i32, i32) {
    %c0_i32 = arith.constant 0 : i32
    %c0_i32_0 = arith.constant 0 : i32
    return %arg0, %c0_i32 : i32, i32
  }
  func.func @transform_2(%arg0: i32, %arg1: i32) -> (i32, i32) {
    %c0_i32 = arith.constant 0 : i32
    %c0_i32_0 = arith.constant 0 : i32
    return %arg1, %c0_i32 : i32, i32
  }
  func.func @transform_3(%arg0: i32, %arg1: i32) -> (i32, i32) {
    %c0_i32 = arith.constant 0 : i32
    %c0_i32_0 = arith.constant 0 : i32
    return %arg1, %c0_i32 : i32, i32
  }
  func.func @transform_4(%arg0: i32, %arg1: i32) -> (i32, i32) {
    %c0_i32 = arith.constant 0 : i32
    %c0_i32_0 = arith.constant 0 : i32
    return %arg0, %c0_i32 : i32, i32
  }
}

</mosaic_0001>

<bundles_post_ra>
// kernel: tpu_custom_call.1
= control target key start
LH: loop header
LB: loop body
LE: loop exit
PB: predicated region body
PF: predicated region fallthrough
CT: control target
= control target key end

     0   :  { %9 = vsyncpa [#allocation5], 0  ;;  %s477_s0 = inlined_call_operand.hbm [shape: f32[8,32], index: 0, kind: input, shape index: {}]   ;;  %s478_s1 = inlined_call_operand.hbm [shape: f32[8,32], index: 1, kind: input, shape index: {}]   ;;  %s479_s2 = inlined_call_operand.hbm [shape: f32[8,32], index: 2, kind: input, shape index: {}]   ;;  %s480_s3 = inlined_call_operand.vmem [shape: f32[8,32], index: 3, kind: input, shape index: {}]   ;;  %s481_s4 = inlined_call_operand.vmem [shape: f32[8,1], index: 4, kind: output, shape index: {}]  }
   0x1   :  { %10 = vsyncpa [#allocation7], 0  ;;  %s389_s15 = smov [#allocation6]   ;;  %s390_s17 = smov [#allocation4]  }
   0x2   :  { %s27_s16 = sshll.u32 %s389_s15, 4  ;;  %s17_s18 = sshll.u32 %s390_s17, 4  ;;  %s28_s16 = int_to_ptr.vmem [resolvable:$true] %s27_s16  ;;  %s18_s18 = int_to_ptr.vmem [resolvable:$true] %s17_s18 }
   0x3   :  { %s319_s21 = scalar_lea.hbm %s478_s1, 128 }
   0x4   :  { %p320_p0 = scmp.ne.s32.totalorder %s478_s1, %s319_s21  ;;  %p323_p1 = scmp.lt.u32.totalorder %s319_s21, %s478_s1 }
   0x6   :  { %p325_p2 = pnand %p323_p1, %p320_p0 }
   0x8   :  { %328 = shalt.err (!%p325_p2)
}
   0x9   :  { %s329_s26 = scalar_lea.vmem %s28_s16, 128  ;;  %p334_p4 = scmp.lt.s32.totalorder %s28_s16, %s28_s16 }
   0xa   :  { %p330_p3 = scmp.ne.s32.totalorder %s28_s16, %s329_s26  ;;  %p335_p5 = scmp.lt.s32.totalorder %s329_s26, %s329_s26 }
   0xc   :  { %p336_p6 = por %p335_p5, %p334_p4 }
   0xe   :  { %p337_p7 = pnand %p336_p6, %p330_p3 }
  0x10   :  { %340 = shalt.err (!%p337_p7)
}
  0x11   :  { %30 = dma.hbm_to_vmem [thread:$0]  %s478_s1, 128, %s28_s16, [#allocation7]  }
  0x12   :  { %s341_s5 = scalar_lea.hbm %s477_s0, 128 }
  0x13   :  { %p342_p8 = scmp.ne.s32.totalorder %s477_s0, %s341_s5  ;;  %p345_p9 = scmp.lt.u32.totalorder %s341_s5, %s477_s0 }
  0x15   :  { %p347_p10 = pnand %p345_p9, %p342_p8 }
  0x17   :  { %350 = shalt.err (!%p347_p10)
}
  0x18   :  { %s351_s10 = scalar_lea.vmem %s18_s18, 128  ;;  %p356_p12 = scmp.lt.s32.totalorder %s18_s18, %s18_s18 }
  0x19   :  { %p352_p11 = scmp.ne.s32.totalorder %s18_s18, %s351_s10  ;;  %p357_p13 = scmp.lt.s32.totalorder %s351_s10, %s351_s10 }
  0x1b   :  { %p358_p0 = por %p357_p13, %p356_p12 }
  0x1d   :  { %p359_p1 = pnand %p358_p0, %p352_p11 }
  0x1f   :  { %362 = shalt.err (!%p359_p1)
}
  0x20   :  { %20 = dma.hbm_to_vmem [thread:$0]  %s477_s0, 128, %s18_s18, [#allocation5]  }
  0x21   :  { %s391_s12 = smov [#allocation8]   ;;  %s363_s16 = scalar_lea.hbm %s479_s2, 128 }
  0x22   :  { %s37_s13 = sshll.u32 %s391_s12, 4  ;;  %p364_p2 = scmp.ne.s32.totalorder %s479_s2, %s363_s16  ;;  %s38_s13 = int_to_ptr.vmem [resolvable:$true] %s37_s13 }
  0x23   :  { %p367_p3 = scmp.lt.u32.totalorder %s363_s16, %s479_s2 }
  0x25   :  { %p369_p4 = pnand %p367_p3, %p364_p2 }
  0x27   :  { %372 = shalt.err (!%p369_p4)
}
  0x28   :  { %s373_s22 = scalar_lea.vmem %s38_s13, 128  ;;  %p378_p6 = scmp.lt.s32.totalorder %s38_s13, %s38_s13 }
  0x29   :  { %p374_p5 = scmp.ne.s32.totalorder %s38_s13, %s373_s22  ;;  %p379_p7 = scmp.lt.s32.totalorder %s373_s22, %s373_s22 }
  0x2b   :  { %p380_p8 = por %p379_p7, %p378_p6 }
  0x2d   :  { %p381_p9 = pnand %p380_p8, %p374_p5 }
  0x2f   :  { %384 = shalt.err (!%p381_p9)
}
  0x30   :  { %40 = dma.hbm_to_vmem [thread:$0]  %s479_s2, 128, %s38_s13, [#allocation7]  }
  0x31   :  { %385 = dma.done.wait [#allocation5], 128  }
  0x32   :  { %386 = vsyncadd [#allocation5], 4294967168 }
  0x33   :  { %387 = dma.done.wait [#allocation7], 256  }
  0x34   :  { %388 = vsyncadd [#allocation7], 4294967040  ;;  %vm56_vm0 = vcmask 7168   ;;  %v392_v0 = vmov 0.0   ;;  %vm393_vm1 = vmmov 0   ;;  %vm62_vm2 = vcmask 261120  }
  0x35   :  { %58 = vst.msk [vmem:[#allocation3] sm:$0xff] %vm56_vm0, %v392_v0  ;;  %292 = vmatprep.subr.mxu0 %v392_v0  ;;  %294 = vmatprep.mubr.msk.f32.mxu0 %vm393_vm1, %v392_v0  ;;  %v61_v1 = vld [vmem:[#allocation8] sm:$0xff]  ;;  %v59_v2 = vld [vmem:[#allocation4] sm:$0xff]  ;;  %v139_v3 = vld [vmem:[%s480_s3] sm:$0xff]  ;;  %vm213_vm3 = vcmask 64512   ;;  %v394_v11 = vmov -inf   ;;  %v224_v19 = vlaneseq }
  0x36   :  { %297 = vmatprep.subr.mxu1 %v392_v0  ;;  %299 = vmatprep.mubr.msk.f32.mxu1 %vm393_vm1, %v392_v0  ;;  %v60_v4 = vmul.f32 2.0, %v59_v2  ;;  %57 = vst.msk [vmem:[#allocation2] sm:$0xff] %vm56_vm0, %v394_v11  ;;  %v395_v12 = vmov 0   ;;  %v265_v28 = vld [vmem:[#allocation6] sm:$0xff] }
  0x37   :  { %293 = vmatpush3.xpose.msk.msra.mxu0 %vm62_vm2, %v61_v1  ;;  %298 = vmatpush3.xpose.msk.msra.mxu1 %vm62_vm2, %v139_v3  ;;  %v225_v20 = vshrl.u32 %v224_v19, 7  ;;  %v230_v21 = vand.u32 127, %v224_v19  ;;  %v266_v30 = vmul.f32 %v265_v28, %v59_v2 }
  0x38   :  { %309 = vset.pattern.permute.xlu1 %v395_v12  ;;  %310 = vset.pattern.permute.xlu0 %v395_v12 }
  0x39   :  { %vm233_vm4 = vcmp.eq.s32.totalorder %v230_v21, %v225_v20  ;;  %v267_v34 = vsel %vm62_vm2, %v266_v30, 0.0 }
  0x3a   :  { %295 = vmatmul.mubr.msk.f32.vlgmr.msra.gmra.mrb[0].mxu0 %vm62_vm2, %v60_v4  ;;  %300 = vmatmul.mubr.msk.f32.vlgmr.msra.gmra.mrb[0].mxu1 %vm62_vm2, %v60_v4 }
  0x3c   :  { %v256_v37 = vld [vmem:[#allocation3] sm:$0xff] }
  0x3d   :  { %v221_v15 = vld [vmem:[#allocation2] sm:$0xff] }
 0x10d   :  { %v135_v5 = vpop.f32.mrb[0].mxu0  ;;  %v209_v6 = vpop.f32.mrb[0].mxu1 }
 0x10e   :  { %v296_v7 = vpop.f32.mrb[1].mxu0  ;;  %v214_v8 = vsel %vm213_vm3, %v135_v5, -inf  ;;  %v301_v9 = vpop.f32.mrb[1].mxu1  ;;  %v217_v10 = vsel %vm213_vm3, %v209_v6, -inf  ;;  %v234_v22 = vsel %vm233_vm4, -1e+30, %v135_v5 }
 0x10f   :  { %215 = vmax.xlane.f32.xlu0 %v214_v8 }
 0x113   :  { %218 = vmax.xlane.f32.xlu0 %v217_v10 }
 0x19c   :  { %v216_v13 = vpop.xlane.xlu0 %215 }
 0x1a0   :  { %v219_v14 = vpop.xlane.xlu0 %218 }
 0x1a1   :  { %v220_v16 = vmax.f32 %v216_v13, %v219_v14 }
 0x1a3   :  { %v222_v17 = vmax.f32 %v221_v15, %v220_v16 }
 0x1a5   :  { %v235_v18 = vsub.f32 %v221_v15, %v222_v17  ;;  %261 = vst.msk [vmem:[#allocation2] sm:$0xff] %vm56_vm0, %v222_v17  ;;  %240 = vperm.xlu1 %309, %v222_v17  }
 0x1a7   :  { %v236_v35 = vmul.f32 1.442695, %v235_v18 }
 0x1ac   :  { %v271_v48 = vld [vmem:[#allocation2] sm:$0xff] }
 0x224   :  { %v241_v23 = vpop.permute.xlu1 %240 }
 0x225   :  { %v243_v24 = vsub.f32 %v234_v22, %v241_v23  ;;  %v249_v25 = vsub.f32 %v209_v6, %v241_v23 }
 0x227   :  { %v244_v26 = vmul.f32 1.442695, %v243_v24  ;;  %v250_v27 = vmul.f32 1.442695, %v249_v25 }
 0x229   :  { %311 = vpow2.f32 %v244_v26 }
 0x22a   :  { %313 = vpow2.f32 %v250_v27 }
 0x22b   :  { %315 = vpow2.f32 %v236_v35 }
 0x233   :  { %v312_v29 = vpop.eup %311 }
 0x234   :  { %v314_v31 = vpop.eup %313  ;;  %v246_v32 = vsel %vm213_vm3, %v312_v29, 0.0 }
 0x235   :  { %v252_v33 = vsel %vm213_vm3, %v314_v31, 0.0  ;;  %247 = vadd.xlane.f32.xlu1 %v246_v32  ;;  %v316_v36 = vpop.eup %315 }
 0x236   :  { %253 = vadd.xlane.f32.xlu0 %v252_v33  ;;  %v257_v41 = vmul.f32 %v316_v36, %v256_v37 }
 0x23a   :  { %268 = vadd.xlane.f32.xlu0 %v267_v34 }
 0x2c2   :  { %v248_v38 = vpop.xlane.xlu1 %247 }
 0x2c3   :  { %v254_v39 = vpop.xlane.xlu0 %253 }
 0x2c4   :  { %v255_v40 = vadd.f32 %v254_v39, %v248_v38 }
 0x2c6   :  { %v258_v42 = vadd.f32 %v257_v41, %v255_v40 }
 0x2c7   :  { %v269_v44 = vpop.xlane.xlu0 %268 }
 0x2c8   :  { %260 = vst.msk [vmem:[#allocation3] sm:$0xff] %vm56_vm0, %v258_v42  ;;  %v270_v46 = vmul.f32 2.0, %v269_v44 }
 0x2cf   :  { %v272_v43 = vld [vmem:[#allocation3] sm:$0xff] }
 0x2d0   :  { %317 = vlog2.f32 %v272_v43 }
 0x2da   :  { %v318_v45 = vpop.eup %317 }
 0x2db   :  { %v274_v47 = vmul.f32 0.6931472, %v318_v45 }
 0x2dd   :  { %v275_v49 = vadd.f32 %v274_v47, %v271_v48 }
 0x2df   :  { %v276_v50 = vsub.f32 %v275_v49, %v270_v46 }
 0x2e1   :  { %277 = vst.msk [vmem:[%s481_s4] sm:$0xff] %vm56_vm0, %v276_v50 }
 0x2e2   :  { %282 = vsyncpa [#allocation5], 1 }
 0x2e3   :  { %283 = vsyncpa [#allocation7], 1 }

</bundles_post_ra>
